<compile_context>
chip_gen: v7x
topology: tpu7x:2x2x1
jax: 0.10.0
libtpu: 0.0.40
codegen_flags: <defaults>
</compile_context>

<pallas_src>
import functools
import math

import jax
import jax.numpy as jnp
from jax.experimental import pallas as pl
from jax.experimental.pallas import tpu as pltpu


_SUBLANE = {4: 8, 2: 16, 1: 32}          # second-minor tiling per dtype itemsize
_BLOCK_BUDGET_BYTES = 16 * 1024 * 1024   # 2 outputs x 2 pipeline buffers
_VMEM_LIMIT_BYTES = 32 * 1024 * 1024     # raised scoped-VMEM limit (safe on v5e/v6e/v7x)


def _teacher_forcer_kernel(x_hbm, inp_ref, tgt_ref, copy_sem, *, rem):
    """Pure-DMA body: copy the two shifted HBM windows of x into the output blocks.

    x_hbm:    (B, L, D) ref left in HBM (pl.ANY) -- no automatic DMA.
    inp_ref:  (1, TL, D) VMEM block of the "input"  output, rows [l*TL, l*TL+TL).
    tgt_ref:  (1, TL, D) VMEM block of the "target" output, same rows.
    copy_sem: (2,) DMA semaphores.
    rem:      static size of the last (possibly partial) length tile.
    """
    b = pl.program_id(0)
    l = pl.program_id(1)
    nt = pl.num_programs(1)
    tl = inp_ref.shape[1]
    row0 = l * tl  # first output row covered by this tile

    def shifted_window_copies(n):
        # input  rows [row0, row0+n) <- x rows [row0,     row0 + n)
        # target rows [row0, row0+n) <- x rows [row0 + 1, row0 + 1 + n)
        cp_inp = pltpu.make_async_copy(
            x_hbm.at[pl.ds(b, 1), pl.ds(row0, n), :],
            inp_ref.at[:, pl.ds(0, n), :],
            copy_sem.at[0],
        )
        cp_tgt = pltpu.make_async_copy(
            x_hbm.at[pl.ds(b, 1), pl.ds(row0 + 1, n), :],
            tgt_ref.at[:, pl.ds(0, n), :],
            copy_sem.at[1],
        )
        cp_inp.start()
        cp_tgt.start()
        cp_inp.wait()
        cp_tgt.wait()

    if rem == tl:
        # (L-1) divides evenly into tiles: every step is a full-size copy.
        shifted_window_copies(tl)
    else:
        @pl.when(l < nt - 1)
        def _():
            shifted_window_copies(tl)

        @pl.when(l == nt - 1)
        def _():
            # Exact-size copy for the remainder tile; rows [rem, tl) of the
            # output block are never written back (Pallas clips the partial
            # edge block), so leftover buffer contents are harmless.
            shifted_window_copies(rem)


def _pick_length_tile(m, d, itemsize, length_tile):
    """Largest legal length tile keeping 2 outputs x 2 buffers under budget."""
    sub = _SUBLANE.get(itemsize, 8)
    d_pad = pl.cdiv(d, 128) * 128                        # lane padding in VMEM
    budget_tl = max(sub, _BLOCK_BUDGET_BYTES // (4 * d_pad * itemsize))
    target = budget_tl if length_tile is None else min(length_tile, budget_tl)
    if m <= target or m <= sub:
        return m                                          # single full-extent tile (always legal)
    return max(sub, (min(target, m) // sub) * sub)        # multiple of the sublane tile


def teacher_forcer(x, length_dim=1, return_len=False, *, length_tile=None):
    """Pallas-TPU implementation of TeacherForcer.forward.

    Returns (x[..., :-1, ...], x[..., 1:, ...][, L-1]) sliced along `length_dim`.
    """
    ndim = x.ndim
    ld = length_dim + ndim if length_dim < 0 else length_dim
    assert 0 <= ld < ndim, "invalid length_dim"
    L = x.shape[ld]
    assert L >= 2, "need at least 2 steps along the length axis"

    # Collapse to a canonical (B, L, D) view (free reshapes on contiguous data).
    B = math.prod(x.shape[:ld]) if ld > 0 else 1
    D = math.prod(x.shape[ld + 1:]) if ld < ndim - 1 else 1
    x3 = x.reshape(B, L, D)

    m = L - 1
    itemsize = jnp.dtype(x.dtype).itemsize
    tl = _pick_length_tile(m, D, itemsize, length_tile)
    nt = pl.cdiv(m, tl)
    rem = m - (nt - 1) * tl

    out_struct = jax.ShapeDtypeStruct((B, m, D), x.dtype)

    def out_block_spec():
        return pl.BlockSpec((1, tl, D), lambda b, l: (b, l, 0))

    grid_spec = pltpu.PrefetchScalarGridSpec(
        num_scalar_prefetch=0,
        grid=(B, nt),
        in_specs=[pl.BlockSpec(memory_space=pl.ANY)],   # x stays in HBM, DMA'd manually
        out_specs=(out_block_spec(), out_block_spec()),
        scratch_shapes=[pltpu.SemaphoreType.DMA((2,))],
    )

    inp3, tgt3 = pl.pallas_call(
        functools.partial(_teacher_forcer_kernel, rem=rem),
        grid_spec=grid_spec,
        out_shape=(out_struct, out_struct),
        compiler_params=pltpu.CompilerParams(
            dimension_semantics=("parallel", "parallel"),
            vmem_limit_bytes=_VMEM_LIMIT_BYTES,
        ),
    )(x3)

    out_shape = x.shape[:ld] + (m,) + x.shape[ld + 1:]
    inp_out = inp3.reshape(out_shape)
    tgt_out = tgt3.reshape(out_shape)
    if return_len:
        return inp_out, tgt_out, m
    return inp_out, tgt_out


class TeacherForcer:
    """Thin stateless mirror of the PyTorch module."""

    def __init__(self, length_dim):
        self.length_dim = length_dim

    def __call__(self, x, return_len=False):
        return teacher_forcer(x, length_dim=self.length_dim, return_len=return_len)


def _check(key, shape, length_dim, dtype, **kw):
    x = jax.random.normal(key, shape, dtype=dtype)
    L = shape[length_dim]
    inp_out, tgt_out, tf_len = teacher_forcer(
        x, length_dim=length_dim, return_len=True, **kw
    )
    jax.block_until_ready((inp_out, tgt_out))

    head = (slice(None),) * length_dim
    ref_inp = x[head + (slice(None, -1),)]
    ref_tgt = x[head + (slice(1, None),)]
    assert tf_len == L - 1
    assert inp_out.shape == ref_inp.shape
    assert tgt_out.shape == ref_tgt.shape
    assert jnp.array_equal(inp_out, ref_inp), f"input slice mismatch for {shape}"
    assert jnp.array_equal(tgt_out, ref_tgt), f"target slice mismatch for {shape}"


if __name__ == "__main__":
    key = jax.random.PRNGKey(0)
    keys = jax.random.split(key, 5)

    # Primary: lane-dense hidden (D=128), multi-tile grid with a remainder tile.
    _check(keys[0], (2, 57, 128), 1, jnp.float32, length_tile=16)
    # Exact tiling, single full tile chosen automatically from the VMEM budget.
    _check(keys[1], (2, 33, 128), 1, jnp.float32)
    # Spec-sized small case (seq=8, hidden=32): full-extent single-tile path.
    _check(keys[2], (2, 8, 32), 1, jnp.float32)
    # bf16 (sublane tiling of 16), multi-tile with remainder.
    _check(keys[3], (2, 41, 128), 1, jnp.bfloat16, length_tile=16)
    # Arbitrary length_dim on a 4-D input (collapsed to (B, L, D) internally).
    _check(keys[4], (2, 3, 10, 16), 2, jnp.float32)

    print("KERNEL_OK")
</pallas_src>

<mosaic_0001>
module attributes {stable_mosaic.version = 11 : i64} {
  func.func @_teacher_forcer_kernel(%arg0: i32, %arg1: i32, %arg2: memref<2x57x128xf32, #tpu.memory_space<any>>, %arg3: memref<1x16x128xf32, #tpu.memory_space<vmem>>, %arg4: memref<1x16x128xf32, #tpu.memory_space<vmem>>, %arg5: memref<2x!tpu.dma_semaphore, #tpu.memory_space<semaphore_mem>>) attributes {dimension_semantics = [#tpu.dimension_semantics<parallel>, #tpu.dimension_semantics<parallel>], iteration_bounds = array<i64: 2, 4>, scalar_prefetch = 0 : i64, scratch_operands = 1 : i64, tpu.core_type = #tpu.core_type<tc>, window_params = [{}, {transform_indices = @transform_1, window_bounds = array<i64: 1, 16, 128>}, {transform_indices = @transform_2, window_bounds = array<i64: 1, 16, 128>}]} {
    %c16_i32 = arith.constant 16 : i32
    %0 = arith.muli %arg1, %c16_i32 : i32
    %c3_i32 = arith.constant 3 : i32
    %1 = arith.cmpi slt, %arg1, %c3_i32 : i32
    %2 = arith.extui %1 : i1 to i32
    %c0_i32 = arith.constant 0 : i32
    %3 = arith.cmpi ne, %2, %c0_i32 : i32
    scf.if %3 {
      %c1_i32 = arith.constant 1 : i32
      %7 = arith.addi %0, %c1_i32 : i32
      %c0_i32_2 = arith.constant 0 : i32
      %c0_i32_3 = arith.constant 0 : i32
      %8 = tpu.memref_slice %arg2[%arg0, %0, %c0_i32_3] : memref<2x57x128xf32, #tpu.memory_space<any>> -> memref<1x16x128xf32, #tpu.memory_space<any>>
      %c0_i32_4 = arith.constant 0 : i32
      %c0_i32_5 = arith.constant 0 : i32
      %c0_i32_6 = arith.constant 0 : i32
      %9 = tpu.memref_slice %arg3[%c0_i32_4, %c0_i32_5, %c0_i32_6] : memref<1x16x128xf32, #tpu.memory_space<vmem>> -> memref<1x16x128xf32, #tpu.memory_space<vmem>>
      %10 = tpu.memref_slice %arg5[%c0_i32_2] : memref<2x!tpu.dma_semaphore, #tpu.memory_space<semaphore_mem>> -> memref<1x!tpu.dma_semaphore, #tpu.memory_space<semaphore_mem>>
      %11 = tpu.memref_squeeze %10 : memref<1x!tpu.dma_semaphore, #tpu.memory_space<semaphore_mem>> -> memref<!tpu.dma_semaphore, #tpu.memory_space<semaphore_mem>>
      tpu.enqueue_dma source(%8 : memref<1x16x128xf32, #tpu.memory_space<any>>) target(%9 : memref<1x16x128xf32, #tpu.memory_space<vmem>>) target_semaphore(%11 : memref<!tpu.dma_semaphore, #tpu.memory_space<semaphore_mem>>)
      %c1_i32_7 = arith.constant 1 : i32
      %c0_i32_8 = arith.constant 0 : i32
      %12 = tpu.memref_slice %arg2[%arg0, %7, %c0_i32_8] : memref<2x57x128xf32, #tpu.memory_space<any>> -> memref<1x16x128xf32, #tpu.memory_space<any>>
      %c0_i32_9 = arith.constant 0 : i32
      %c0_i32_10 = arith.constant 0 : i32
      %c0_i32_11 = arith.constant 0 : i32
      %13 = tpu.memref_slice %arg4[%c0_i32_9, %c0_i32_10, %c0_i32_11] : memref<1x16x128xf32, #tpu.memory_space<vmem>> -> memref<1x16x128xf32, #tpu.memory_space<vmem>>
      %14 = tpu.memref_slice %arg5[%c1_i32_7] : memref<2x!tpu.dma_semaphore, #tpu.memory_space<semaphore_mem>> -> memref<1x!tpu.dma_semaphore, #tpu.memory_space<semaphore_mem>>
      %15 = tpu.memref_squeeze %14 : memref<1x!tpu.dma_semaphore, #tpu.memory_space<semaphore_mem>> -> memref<!tpu.dma_semaphore, #tpu.memory_space<semaphore_mem>>
      tpu.enqueue_dma source(%12 : memref<1x16x128xf32, #tpu.memory_space<any>>) target(%13 : memref<1x16x128xf32, #tpu.memory_space<vmem>>) target_semaphore(%15 : memref<!tpu.dma_semaphore, #tpu.memory_space<semaphore_mem>>)
      %c0_i32_12 = arith.constant 0 : i32
      %c0_i32_13 = arith.constant 0 : i32
      %16 = tpu.memref_slice %arg2[%arg0, %0, %c0_i32_13] : memref<2x57x128xf32, #tpu.memory_space<any>> -> memref<1x16x128xf32, #tpu.memory_space<any>>
      %c0_i32_14 = arith.constant 0 : i32
      %c0_i32_15 = arith.constant 0 : i32
      %c0_i32_16 = arith.constant 0 : i32
      %17 = tpu.memref_slice %arg3[%c0_i32_14, %c0_i32_15, %c0_i32_16] : memref<1x16x128xf32, #tpu.memory_space<vmem>> -> memref<1x16x128xf32, #tpu.memory_space<vmem>>
      %18 = tpu.memref_slice %arg5[%c0_i32_12] : memref<2x!tpu.dma_semaphore, #tpu.memory_space<semaphore_mem>> -> memref<1x!tpu.dma_semaphore, #tpu.memory_space<semaphore_mem>>
      %19 = tpu.memref_squeeze %18 : memref<1x!tpu.dma_semaphore, #tpu.memory_space<semaphore_mem>> -> memref<!tpu.dma_semaphore, #tpu.memory_space<semaphore_mem>>
      tpu.wait_dma2 semaphore(%19 : memref<!tpu.dma_semaphore, #tpu.memory_space<semaphore_mem>>) src(%16 : memref<1x16x128xf32, #tpu.memory_space<any>>) dst(%17 : memref<1x16x128xf32, #tpu.memory_space<vmem>>)
      %c1_i32_17 = arith.constant 1 : i32
      %c0_i32_18 = arith.constant 0 : i32
      %20 = tpu.memref_slice %arg2[%arg0, %7, %c0_i32_18] : memref<2x57x128xf32, #tpu.memory_space<any>> -> memref<1x16x128xf32, #tpu.memory_space<any>>
      %c0_i32_19 = arith.constant 0 : i32
      %c0_i32_20 = arith.constant 0 : i32
      %c0_i32_21 = arith.constant 0 : i32
      %21 = tpu.memref_slice %arg4[%c0_i32_19, %c0_i32_20, %c0_i32_21] : memref<1x16x128xf32, #tpu.memory_space<vmem>> -> memref<1x16x128xf32, #tpu.memory_space<vmem>>
      %22 = tpu.memref_slice %arg5[%c1_i32_17] : memref<2x!tpu.dma_semaphore, #tpu.memory_space<semaphore_mem>> -> memref<1x!tpu.dma_semaphore, #tpu.memory_space<semaphore_mem>>
      %23 = tpu.memref_squeeze %22 : memref<1x!tpu.dma_semaphore, #tpu.memory_space<semaphore_mem>> -> memref<!tpu.dma_semaphore, #tpu.memory_space<semaphore_mem>>
      tpu.wait_dma2 semaphore(%23 : memref<!tpu.dma_semaphore, #tpu.memory_space<semaphore_mem>>) src(%20 : memref<1x16x128xf32, #tpu.memory_space<any>>) dst(%21 : memref<1x16x128xf32, #tpu.memory_space<vmem>>)
    } else {
    }
    %c3_i32_0 = arith.constant 3 : i32
    %4 = arith.cmpi eq, %arg1, %c3_i32_0 : i32
    %5 = arith.extui %4 : i1 to i32
    %c0_i32_1 = arith.constant 0 : i32
    %6 = arith.cmpi ne, %5, %c0_i32_1 : i32
    scf.if %6 {
      %c1_i32 = arith.constant 1 : i32
      %7 = arith.addi %0, %c1_i32 : i32
      %c0_i32_2 = arith.constant 0 : i32
      %c0_i32_3 = arith.constant 0 : i32
      %8 = tpu.memref_slice %arg2[%arg0, %0, %c0_i32_3] : memref<2x57x128xf32, #tpu.memory_space<any>> -> memref<1x8x128xf32, #tpu.memory_space<any>>
      %c0_i32_4 = arith.constant 0 : i32
      %c0_i32_5 = arith.constant 0 : i32
      %c0_i32_6 = arith.constant 0 : i32
      %9 = tpu.memref_slice %arg3[%c0_i32_4, %c0_i32_5, %c0_i32_6] : memref<1x16x128xf32, #tpu.memory_space<vmem>> -> memref<1x8x128xf32, #tpu.memory_space<vmem>>
      %10 = tpu.memref_slice %arg5[%c0_i32_2] : memref<2x!tpu.dma_semaphore, #tpu.memory_space<semaphore_mem>> -> memref<1x!tpu.dma_semaphore, #tpu.memory_space<semaphore_mem>>
      %11 = tpu.memref_squeeze %10 : memref<1x!tpu.dma_semaphore, #tpu.memory_space<semaphore_mem>> -> memref<!tpu.dma_semaphore, #tpu.memory_space<semaphore_mem>>
      tpu.enqueue_dma source(%8 : memref<1x8x128xf32, #tpu.memory_space<any>>) target(%9 : memref<1x8x128xf32, #tpu.memory_space<vmem>>) target_semaphore(%11 : memref<!tpu.dma_semaphore, #tpu.memory_space<semaphore_mem>>)
      %c1_i32_7 = arith.constant 1 : i32
      %c0_i32_8 = arith.constant 0 : i32
      %12 = tpu.memref_slice %arg2[%arg0, %7, %c0_i32_8] : memref<2x57x128xf32, #tpu.memory_space<any>> -> memref<1x8x128xf32, #tpu.memory_space<any>>
      %c0_i32_9 = arith.constant 0 : i32
      %c0_i32_10 = arith.constant 0 : i32
      %c0_i32_11 = arith.constant 0 : i32
      %13 = tpu.memref_slice %arg4[%c0_i32_9, %c0_i32_10, %c0_i32_11] : memref<1x16x128xf32, #tpu.memory_space<vmem>> -> memref<1x8x128xf32, #tpu.memory_space<vmem>>
      %14 = tpu.memref_slice %arg5[%c1_i32_7] : memref<2x!tpu.dma_semaphore, #tpu.memory_space<semaphore_mem>> -> memref<1x!tpu.dma_semaphore, #tpu.memory_space<semaphore_mem>>
      %15 = tpu.memref_squeeze %14 : memref<1x!tpu.dma_semaphore, #tpu.memory_space<semaphore_mem>> -> memref<!tpu.dma_semaphore, #tpu.memory_space<semaphore_mem>>
      tpu.enqueue_dma source(%12 : memref<1x8x128xf32, #tpu.memory_space<any>>) target(%13 : memref<1x8x128xf32, #tpu.memory_space<vmem>>) target_semaphore(%15 : memref<!tpu.dma_semaphore, #tpu.memory_space<semaphore_mem>>)
      %c0_i32_12 = arith.constant 0 : i32
      %c0_i32_13 = arith.constant 0 : i32
      %16 = tpu.memref_slice %arg2[%arg0, %0, %c0_i32_13] : memref<2x57x128xf32, #tpu.memory_space<any>> -> memref<1x8x128xf32, #tpu.memory_space<any>>
      %c0_i32_14 = arith.constant 0 : i32
      %c0_i32_15 = arith.constant 0 : i32
      %c0_i32_16 = arith.constant 0 : i32
      %17 = tpu.memref_slice %arg3[%c0_i32_14, %c0_i32_15, %c0_i32_16] : memref<1x16x128xf32, #tpu.memory_space<vmem>> -> memref<1x8x128xf32, #tpu.memory_space<vmem>>
      %18 = tpu.memref_slice %arg5[%c0_i32_12] : memref<2x!tpu.dma_semaphore, #tpu.memory_space<semaphore_mem>> -> memref<1x!tpu.dma_semaphore, #tpu.memory_space<semaphore_mem>>
      %19 = tpu.memref_squeeze %18 : memref<1x!tpu.dma_semaphore, #tpu.memory_space<semaphore_mem>> -> memref<!tpu.dma_semaphore, #tpu.memory_space<semaphore_mem>>
      tpu.wait_dma2 semaphore(%19 : memref<!tpu.dma_semaphore, #tpu.memory_space<semaphore_mem>>) src(%16 : memref<1x8x128xf32, #tpu.memory_space<any>>) dst(%17 : memref<1x8x128xf32, #tpu.memory_space<vmem>>)
      %c1_i32_17 = arith.constant 1 : i32
      %c0_i32_18 = arith.constant 0 : i32
      %20 = tpu.memref_slice %arg2[%arg0, %7, %c0_i32_18] : memref<2x57x128xf32, #tpu.memory_space<any>> -> memref<1x8x128xf32, #tpu.memory_space<any>>
      %c0_i32_19 = arith.constant 0 : i32
      %c0_i32_20 = arith.constant 0 : i32
      %c0_i32_21 = arith.constant 0 : i32
      %21 = tpu.memref_slice %arg4[%c0_i32_19, %c0_i32_20, %c0_i32_21] : memref<1x16x128xf32, #tpu.memory_space<vmem>> -> memref<1x8x128xf32, #tpu.memory_space<vmem>>
      %22 = tpu.memref_slice %arg5[%c1_i32_17] : memref<2x!tpu.dma_semaphore, #tpu.memory_space<semaphore_mem>> -> memref<1x!tpu.dma_semaphore, #tpu.memory_space<semaphore_mem>>
      %23 = tpu.memref_squeeze %22 : memref<1x!tpu.dma_semaphore, #tpu.memory_space<semaphore_mem>> -> memref<!tpu.dma_semaphore, #tpu.memory_space<semaphore_mem>>
      tpu.wait_dma2 semaphore(%23 : memref<!tpu.dma_semaphore, #tpu.memory_space<semaphore_mem>>) src(%20 : memref<1x8x128xf32, #tpu.memory_space<any>>) dst(%21 : memref<1x8x128xf32, #tpu.memory_space<vmem>>)
    } else {
    }
    return
  }
  func.func @transform_1(%arg0: i32, %arg1: i32) -> (i32, i32, i32) {
    %c0_i32 = arith.constant 0 : i32
    %c0_i32_0 = arith.constant 0 : i32
    return %arg0, %arg1, %c0_i32 : i32, i32, i32
  }
  func.func @transform_2(%arg0: i32, %arg1: i32) -> (i32, i32, i32) {
    %c0_i32 = arith.constant 0 : i32
    %c0_i32_0 = arith.constant 0 : i32
    return %arg0, %arg1, %c0_i32 : i32, i32, i32
  }
}

</mosaic_0001>

<bundles_post_ra>
// kernel: tpu_custom_call.1
= control target key start
LH: loop header
LB: loop body
LE: loop exit
PB: predicated region body
PF: predicated region fallthrough
CT: control target
= control target key end

     0   :  { %8 = vsyncpa [#allocation4], 0  ;;  %s924_s0 = inlined_call_operand.vmem [shape: f32[2,57,128], index: 0, kind: input, shape index: {}]   ;;  %s925_s1 = inlined_call_operand.hbm [shape: f32[2,56,128], index: 1, kind: output, shape index: {0}]   ;;  %s926_s2 = inlined_call_operand.hbm [shape: f32[2,56,128], index: 2, kind: output, shape index: {1}]  }
   0x1   :  { %10 = vsyncpa [#allocation4 + $0x1], 0 }
   0x2   :  { %11 = vsyncpa [#allocation6], 0 }
   0x3   :  { %13 = vsyncpa [#allocation6 + $0x1], 0  ;;  %s737_s9 = smov 0   ;;  %s739_s10 = smov 0  }
   0x4   :  { %s741_s11 = smov 0   ;;  %s743_s12 = smov 0  }
   0x5   :  { %s745_s13 = smov 0  }
   0x6 LB: > { %s25_s14 = sadd.s32 1, %s706_s11  ;;  %s28_s15 = sadd.s32 1, %s710_s12  ;;  %s714_s13 = sphi %s745_s13, %s19_s13   ;;  %s710_s12 = sphi %s743_s12, %s932_s12   ;;  %s706_s11 = sphi %s741_s11, %s931_s11   ;;  %s702_s10 = sphi %s739_s10, %s930_s10   ;;  %s698_s9 = sphi %s737_s9, %s929_s9  }
   0x7   : > { %p26_p0 = scmp.ge.s32.totalorder %s25_s14, 4  ;;  %s510_s16 = sadd.s32 4294967295, %s714_s13  }
   0x8   : > { %p46_p1 = scmp.ne.s32.totalorder %s702_s10, %s698_s9  ;;  %p47_p3 = scmp.eq.s32.totalorder %s510_s16, 7 }
   0x9   : > { %s934_s14 = smov (%p26_p0, %s25_s14), 0  ;;  %s936_s15 = smov (!%p26_p0, %s28_s15), %s710_s12 }
   0xa   : > { %p30_p2 = scmp.ge.s32.totalorder %s936_s15, 2  ;;  %s33_s17 = ssub.s32 %s706_s11, %s934_s14 }
   0xb   : > { %p774_p4 = por %p47_p3, %p46_p1  ;;  %s37_s20 = sadd.s32 1, %s702_s10 }
   0xc   : > { %s938_s15 = smov (%p30_p2, %s936_s15), 0  ;;  %p41_p5 = scmp.eq.s32.totalorder %s714_s13, 7 }
   0xd   : > { %s32_s19 = ssub.s32 %s710_s12, %s938_s15  ;;  %p513_p9 = scmp.ge.s32.totalorder %s714_s13, 8 }
   0xe   : > { %s34_s21 = sor.u32 %s33_s17, %s32_s19  ;;  %s791_s24 = sand.u32 (!%p513_p9), 1, %s702_s10  }
   0xf   : > { %p35_p6 = scmp.eq.s32.totalorder %s34_s21, 0  ;;  %p511_p7 = scmp.ne.s32.totalorder %s34_s21, 0 }
  0x10   : > { %77 = sbr.rel (%p513_p9) target bundleno = 126 (0x7e), region = 12  ;;  %s516_s25 = sshll.u32 (!%p513_p9), %s706_s11, 4 }
  0x11   : > { %s783_s22 = scalar_select %p35_p6, %s702_s10, %s37_s20  }
  0x12   : > { %p785_p8 = por %p511_p7, %p41_p5  ;;  %s514_s26 = sshll.u32 (!%p513_p9), %s791_s24, 4 }
  0x13   : > { %s795_s27 = scalar_lea.vmem (!%p513_p9), [#allocation3], %s514_s26  ;;  %s797_s28 = scalar_lea.vmem (!%p513_p9), [#allocation5], %s514_s26 }
  0x14   : > { %p517_p10 = scmp.ge.s32.totalorder (!%p513_p9), %s706_s11, 3 }
  0x17   : > { %106 = sbr.rel (%p517_p10) target bundleno = 37 (0x25), region = 16  ;;  %s518_s29 = sshll.u32 (!%p517_p10), %s710_s12, 6 }
  0x18   : > { %s109_s30 = sadd.s32 (!%p517_p10), %s518_s29, %s516_s25 }
  0x19   : > { %s110_s5 = scalar_lea.vmem (!%p517_p10), %s924_s0, %s109_s30 }
  0x1a   : > { %v143_v0 = vld [vmem:[%s110_s5] sm:$0xff] (!%p517_p10)  ;;  %v145_v1 = vld [vmem:[%s110_s5 + $0x8] sm:$0xff] (!%p517_p10) }
  0x1b   : > { %144 = vst [vmem:[%s795_s27] sm:$0xff] (!%p517_p10), %v143_v0  ;;  %146 = vst [vmem:[%s795_s27 + $0x8] sm:$0xff] (!%p517_p10), %v145_v1 }
  0x1e   : > { %154 = vsyncadd [#allocation2], 256  ;;  %v521_v2 = vld [vmem:[%s110_s5 + $0x1] sm:$0xff]  ;;  %v522_v3 = vld [vmem:[%s110_s5 + $0x9] sm:$0xff] }
  0x1f   : > { %191 = vst [vmem:[%s797_s28] sm:$0xff] %v521_v2  ;;  %193 = vst [vmem:[%s797_s28 + $0x8] sm:$0xff] %v522_v3 }
  0x20   : > { %201 = vsyncadd [#allocation2 + $0x1], 256 }
  0x21   : > { %680 = dma.done.wait [#allocation2], 256 }
  0x22   : > { %681 = vsyncadd [#allocation2], 4294967040 }
  0x23   : > { %682 = dma.done.wait [#allocation2 + $0x1], 256 }
  0x24   : > { %683 = vsyncadd [#allocation2 + $0x1], 4294967040 }
  0x25 PF: > { %p524_p11 = scmp.ne.s32.totalorder %s706_s11, 3 }
  0x26   : > { %s525_s6 = sshll.u32 (!%p524_p11), %s710_s12, 6 }
  0x27   : > { %211 = sbr.rel (%p524_p11) target bundleno = 53 (0x35), region = 88  ;;  %s214_s7 = sadd.s32 (!%p524_p11), %s525_s6, %s516_s25 }
  0x28   : > { %s215_s17 = scalar_lea.vmem (!%p524_p11), %s924_s0, %s214_s7 }
  0x29   : > { %v248_v4 = vld [vmem:[%s215_s17] sm:$0xff] (!%p524_p11) }
  0x2a   : > { %249 = vst [vmem:[%s795_s27] sm:$0xff] (!%p524_p11), %v248_v4 }
  0x2e   : > { %257 = vsyncadd [#allocation2], 128  ;;  %v528_v5 = vld [vmem:[%s215_s17 + $0x1] sm:$0xff] }
  0x2f   : > { %294 = vst [vmem:[%s797_s28] sm:$0xff] %v528_v5 }
  0x30   : > { %302 = vsyncadd [#allocation2 + $0x1], 128 }
  0x31   : > { %684 = dma.done.wait [#allocation2], 128 }
  0x32   : > { %685 = vsyncadd [#allocation2], 4294967168 }
  0x33   : > { %686 = dma.done.wait [#allocation2 + $0x1], 128 }
  0x34   : > { %687 = vsyncadd [#allocation2 + $0x1], 4294967168 }
  0x35 PF: > { %s310_s19 = scalar_lea.sflag [#allocation4], %s791_s24  ;;  %s315_s20 = scalar_lea.sflag [#allocation6], %s791_s24 }
  0x36   : > { %321 = sbr.rel (!%p785_p8) target bundleno = 90 (0x5a), region = 160  ;;  %s532_s21 = sshll.u32 (%p785_p8), %s706_s11, 1 }
  0x37   : > { %s323_s25 = ssub.s32 (%p785_p8), 7, %s532_s21 }
  0x38   : > { %p324_p12 = scmp.lt.s32.totalorder (%p785_p8), %s323_s25, 2 }
  0x3d   : > { %s940_s25 = smov (!%p324_p12, %s323_s25), 2 }
  0x3e   : > { %s820_s26 = sshll.u32 %s940_s25, 7 }
  0x3f   : > { %s328_s29 = ssub.s32 256, %s820_s26 }
  0x40   : > { %329 = vsyncadd %s310_s19, %s328_s29  ;;  %p534_p13 = scmp.ne.s32.totalorder %s820_s26, 0  ;;  %s548_s30 = smul.u32 7, %s710_s12 }
  0x41   : > { %s336_s3 = sshll.u32 %s795_s27, 4  ;;  %s716_s17 = smov [#allocation3]   ;;  %s828_s3 = int_to_ptr.vmem [resolvable:$true] %s336_s3 }
  0x42   : > { %s332_s4 = sadd.s32 %s548_s30, %s532_s21  ;;  %s604_s16 = scalar_lea.vmem %s828_s3, %s820_s26 }
  0x43   : > { %s535_s5 = sshll.u32 %s332_s4, 7  ;;  %p605_p0 = scmp.ne.s32.totalorder %s828_s3, %s604_s16 }
  0x44   : > { %s833_s8 = scalar_lea.hbm %s925_s1, %s535_s5  ;;  %s608_s25 = sshll.u32 %s716_s17, 4  ;;  %s609_s25 = int_to_ptr.vmem [resolvable:$false] %s608_s25 }
  0x45   : > { %p606_p1 = pnand %p605_p0, %p534_p13  ;;  %s610_s27 = scalar_lea.vmem %s609_s25, 512 }
  0x46   : > { %p611_p3 = scmp.lt.s32.totalorder %s828_s3, %s609_s25  ;;  %p612_p5 = scmp.lt.s32.totalorder %s610_s27, %s604_s16 }
  0x47   : > { %p607_p2 = pneg %p606_p1 }
  0x48   : > { %p613_p6 = por %p612_p5, %p611_p3 }
  0x4a   : > { %p614_p7 = pnand %p613_p6, %p607_p2 }
  0x4c   : > { %617 = shalt.err (!%p614_p7)
}
  0x4d   : > { %s618_s21 = scalar_lea.hbm %s833_s8, %s820_s26  ;;  %s622_s4 = scalar_lea.hbm %s925_s1, 1792 }
  0x4e   : > { %p619_p9 = scmp.ne.s32.totalorder %s833_s8, %s618_s21  ;;  %p623_p12 = scmp.lt.u32.totalorder %s833_s8, %s925_s1 }
  0x4f   : > { %p624_p0 = scmp.lt.u32.totalorder %s622_s4, %s618_s21  ;;  %p626_p2 = scmp.lt.u32.totalorder %s618_s21, %s833_s8 }
  0x50   : > { %p620_p10 = pnand %p619_p9, %p534_p13 }
  0x51   : > { %p625_p1 = por %p624_p0, %p623_p12 }
  0x52   : > { %p621_p11 = pneg %p620_p10 }
  0x53   : > { %p627_p3 = por %p626_p2, %p625_p1 }
  0x55   : > { %p628_p5 = pnand %p627_p3, %p621_p11 }
  0x57   : > { %631 = shalt.err (!%p628_p5)
}
  0x58   : > { %s717_s7 = smov 128   ;;  %s718_s16 = smov 8  }
  0x59   : > { %342 = dma.vmem_to_hbm [thread:$0]  (%p534_p13), %s828_s3, %s820_s26, %s833_s8, %s310_s19, %s717_s7, %s717_s7, %s718_s16  }
  0x5a PF: > { %345 = sbr.rel (!%p785_p8) target bundleno = 126 (0x7e), region = 164  ;;  %s538_s17 = sshll.u32 (%p785_p8), %s706_s11, 1 }
  0x5b   : > { %s347_s25 = ssub.s32 (%p785_p8), 7, %s538_s17 }
  0x5c   : > { %p348_p6 = scmp.lt.s32.totalorder (%p785_p8), %s347_s25, 2 }
  0x61   : > { %s942_s25 = smov (!%p348_p6, %s347_s25), 2 }
  0x62   : > { %s864_s27 = sshll.u32 %s942_s25, 7 }
  0x63   : > { %s352_s21 = ssub.s32 256, %s864_s27 }
  0x64   : > { %353 = vsyncadd %s315_s20, %s352_s21  ;;  %p540_p13 = scmp.ne.s32.totalorder %s864_s27, 0  ;;  %s549_s23 = smul.u32 7, %s710_s12 }
  0x65   : > { %s360_s19 = sshll.u32 %s797_s28, 4  ;;  %s719_s4 = smov [#allocation5]   ;;  %s872_s19 = int_to_ptr.vmem [resolvable:$true] %s360_s19 }
  0x66   : > { %s356_s26 = sadd.s32 %s549_s23, %s538_s17  ;;  %s632_s30 = scalar_lea.vmem %s872_s19, %s864_s27 }
  0x67   : > { %s541_s11 = sshll.u32 %s356_s26, 7  ;;  %p633_p8 = scmp.ne.s32.totalorder %s872_s19, %s632_s30 }
  0x68   : > { %s877_s29 = scalar_lea.hbm %s926_s2, %s541_s11  ;;  %s636_s12 = sshll.u32 %s719_s4, 4  ;;  %s637_s12 = int_to_ptr.vmem [resolvable:$false] %s636_s12 }
  0x69   : > { %p634_p7 = pnand %p633_p8, %p540_p13  ;;  %s638_s28 = scalar_lea.vmem %s637_s12, 512 }
  0x6a   : > { %p639_p10 = scmp.lt.s32.totalorder %s872_s19, %s637_s12  ;;  %p640_p11 = scmp.lt.s32.totalorder %s638_s28, %s632_s30 }
  0x6b   : > { %p635_p9 = pneg %p634_p7 }
  0x6c   : > { %p641_p12 = por %p640_p11, %p639_p10 }
  0x6e   : > { %p642_p0 = pnand %p641_p12, %p635_p9 }
  0x70   : > { %645 = shalt.err (!%p642_p0)
}
  0x71   : > { %s646_s5 = scalar_lea.hbm %s877_s29, %s864_s27  ;;  %s650_s16 = scalar_lea.hbm %s926_s2, 1792 }
  0x72   : > { %p647_p1 = scmp.ne.s32.totalorder %s877_s29, %s646_s5  ;;  %p651_p5 = scmp.lt.u32.totalorder %s877_s29, %s926_s2 }
  0x73   : > { %p652_p6 = scmp.lt.u32.totalorder %s650_s16, %s646_s5  ;;  %p654_p7 = scmp.lt.u32.totalorder %s646_s5, %s877_s29 }
  0x74   : > { %p648_p2 = pnand %p647_p1, %p540_p13 }
  0x75   : > { %p653_p8 = por %p652_p6, %p651_p5 }
  0x76   : > { %p649_p3 = pneg %p648_p2 }
  0x77   : > { %p655_p9 = por %p654_p7, %p653_p8 }
  0x79   : > { %p656_p10 = pnand %p655_p9, %p649_p3 }
  0x7b   : > { %659 = shalt.err (!%p656_p10)
}
  0x7c   : > { %s720_s21 = smov 128   ;;  %s721_s23 = smov 8  }
  0x7d   : > { %366 = dma.vmem_to_hbm [thread:$0]  (%p540_p13), %s872_s19, %s864_s27, %s877_s29, %s315_s20, %s720_s21, %s720_s21, %s721_s23  }
  0x7e PF: > { %p559_p11 = scmp.ge.s32.totalorder %s714_s13, 1  ;;  %s375_s26 = sand.u32 1, %s698_s9  }
  0x7f   : > { %s376_s11 = scalar_lea.sflag [#allocation4], %s375_s26 }
  0x80   : > { %p553_p12 = pnand %p559_p11, %p774_p4 }
  0x82   : > { %689 = dma.done.wait (!%p553_p12), %s376_s11, 256  }
  0x83   : > { %691 = vsyncadd (!%p553_p12), %s376_s11, 4294967040  ;;  %s385_s3 = scalar_lea.sflag [#allocation6], %s375_s26 }
  0x84   : > { %693 = dma.done.wait (!%p553_p12), %s385_s3, 256  }
  0x85   : > { %695 = vsyncadd (!%p553_p12), %s385_s3, 4294967040  ;;  %s19_s13 = sadd.s32 1, %s714_s13   ;;  %s929_s9 = smov %s702_s10 }
  0x86   : > { %p16_p0 = scmp.ge.s32.totalorder %s19_s13, 9   ;;  %s930_s10 = smov %s783_s22 }
  0x87   : > { %s931_s11 = smov %s934_s14  ;;  %s932_s12 = smov %s938_s15 }
  0x88   :  { %18 = sbr.rel (!%p16_p0) target bundleno = 6 (0x6), region = 244 }
  0x8f   :  { %390 = vsyncpa [#allocation4], 1 }
  0x90   :  { %392 = vsyncpa [#allocation4 + $0x1], 1 }
  0x91   :  { %393 = vsyncpa [#allocation6], 1 }
  0x92   :  { %395 = vsyncpa [#allocation6 + $0x1], 1 }
  0x93   :  { %396 = vsyncmov [#allocation2] }
  0x96   :  { %s397_s18 = vpop.sfrf %396 }
  0x97   :  { %p546_p4 = scmp.ne.s32.totalorder %s397_s18, 0 }
  0x99   :  { %401 = shalt.err (%p546_p4)  }
  0x9a   :  { %403 = vsyncmov [#allocation2 + $0x1] }
  0x9d   :  { %s404_s24 = vpop.sfrf %403 }
  0x9e   :  { %p547_p13 = scmp.ne.s32.totalorder %s404_s24, 0 }
  0xa0   :  { %408 = shalt.err (%p547_p13)  }

</bundles_post_ra>
